<compile_context>
chip_gen: v5e
topology: v5e:2x2
jax: 0.10.0
libtpu: 0.0.40
codegen_flags: <defaults>
</compile_context>

<pallas_src>
import math

import numpy as np
import jax
import jax.numpy as jnp
from jax.experimental import pallas as pl
from jax.experimental.pallas import tpu as pltpu


# --------------------------------------------------------------------------- #
# Positional-encoding table (matches the torch module __init__, float32).
# --------------------------------------------------------------------------- #
def _build_pe(d_model: int, max_len: int = 256) -> jnp.ndarray:
    pe = np.zeros((max_len, d_model), dtype=np.float32)
    position = np.arange(0, max_len, dtype=np.float32)[:, None]          # (max_len, 1)
    div_term = np.exp(np.arange(0, d_model, 2, dtype=np.float32)
                      * (-np.log(10000.0) / d_model))                    # (ceil(d/2),)
    pe[:, 0::2] = np.sin(position * div_term)
    pe[:, 1::2] = np.cos(position * div_term[: (d_model // 2)])
    return jnp.asarray(pe)                                               # (max_len, d_model)


# --------------------------------------------------------------------------- #
# Kernel body: identical (tS, Df) tiles -> pure vld / vadd / vst.
# The add happens in the promoted output dtype (torch: x + f32 buffer -> f32).
# --------------------------------------------------------------------------- #
def _pos_enc_kernel(x_ref, pe_ref, o_ref):
    o_ref[...] = x_ref[...].astype(o_ref.dtype) + pe_ref[...]


def _tile_budget_bytes() -> int:
    """Generation-aware tile target: conservative on v5e, larger on v6e/v7x."""
    try:
        kind = jax.devices()[0].device_kind.lower()
    except Exception:
        kind = ""
    if "v5e" in kind or "v5 lite" in kind or "v5lite" in kind:
        return 2 * 1024 * 1024
    if "v7" in kind:
        return 6 * 1024 * 1024
    return 4 * 1024 * 1024          # v6e and unknown


# --------------------------------------------------------------------------- #
# Wrapper: out = x + pe[:S, :] broadcast over the batch axis.
# --------------------------------------------------------------------------- #
def positional_encoding(x: jnp.ndarray, pe: jnp.ndarray) -> jnp.ndarray:
    B, S, D = x.shape
    max_len = pe.shape[0]
    if S > max_len:
        raise ValueError(
            f"sequence length {S} exceeds positional-encoding max_len {max_len}")

    # torch promotes x + float32 buffer; match numerics and output dtype.
    out_dtype = jnp.result_type(x.dtype, pe.dtype)
    pe_slice = pe[:S, :].astype(out_dtype)                 # (S, D), tiny, static slice

    x_isz = jnp.dtype(x.dtype).itemsize
    o_isz = jnp.dtype(out_dtype).itemsize
    sub = {4: 8, 2: 16, 1: 32}.get(x_isz, 8)               # sublane packing per dtype

    # ---- lane-dense per-position layout (Sf, Df), widest Df % 128 == 0 ----
    if D % 128 == 0:
        Sf, Df = S, D
    elif (S * D) % 128 == 0:
        Df = 128
        for cand in (1024, 512, 256):
            if (S * D) % cand == 0:
                Df = cand
                break
        Sf = (S * D) // Df
    else:
        # TODO(synk): ragged lane width (neither D nor S*D multiple of 128);
        # natural layout -> masked partial stores (correct, slower).
        Sf, Df = S, D

    tile_budget = _tile_budget_bytes()
    rows_budget = max(1, tile_budget // (Df * max(x_isz, o_isz)))

    cost = pl.CostEstimate(
        flops=B * S * D,
        transcendentals=0,
        bytes_accessed=B * S * D * (x_isz + o_isz) + S * D * o_isz,
    )
    vmem_limit = 48 * 1024 * 1024   # safe on v7x (64 MiB physical), ample on v5e/v6e

    # ---------------- small-slab regime: fold batch into the row axis -------
    fold = (B > 1) and (Sf * Df * x_isz < 512 * 1024)
    if fold:
        k = max(1, min(B, rows_budget // Sf))              # batches per row tile
        if (k * Sf) % sub != 0 and k < B:
            # keep the row-tile sublane-aligned unless it already spans all rows
            g = sub // math.gcd(Sf, sub)                   # k-step that keeps k*Sf aligned
            if k >= g:
                k = (k // g) * g
            else:
                fold = False                               # cannot tile cleanly -> 2-D grid

    if fold:
        tS = k * Sf
        total_rows = B * Sf
        n_blocks = pl.cdiv(total_rows, tS)

        xf = x.reshape(total_rows, Df)
        # pe replicated to exactly one tile; constant index_map -> fetched once,
        # resident for the whole kernel (block starts are multiples of Sf).
        pe_rep = jnp.tile(pe_slice.reshape(Sf, Df), (k, 1))

        out = pl.pallas_call(
            _pos_enc_kernel,
            out_shape=jax.ShapeDtypeStruct((total_rows, Df), out_dtype),
            grid_spec=pltpu.PrefetchScalarGridSpec(
                num_scalar_prefetch=0,
                grid=(n_blocks,),
                in_specs=[
                    pl.BlockSpec((tS, Df), lambda r: (r, 0)),   # x row tile
                    pl.BlockSpec((tS, Df), lambda r: (0, 0)),   # pe tile, constant/resident
                ],
                out_specs=pl.BlockSpec((tS, Df), lambda r: (r, 0)),
            ),
            compiler_params=pltpu.CompilerParams(
                # single parallel axis -> shards across the 2 TCs on v7x
                dimension_semantics=("parallel",),
                vmem_limit_bytes=vmem_limit,
            ),
            cost_estimate=cost,
        )(xf, pe_rep)
        return out.reshape(B, S, D)

    # ---------------- large-slab regime: (seq tiles, batch) grid -------------
    rows = max(sub, (rows_budget // sub) * sub)            # sublane-aligned tile height
    tS = min(Sf, rows)
    n_sf = pl.cdiv(Sf, tS)

    xf = x.reshape(B, Sf, Df)
    pef = pe_slice.reshape(Sf, Df)

    out = pl.pallas_call(
        _pos_enc_kernel,
        out_shape=jax.ShapeDtypeStruct((B, Sf, Df), out_dtype),
        grid_spec=pltpu.PrefetchScalarGridSpec(
            num_scalar_prefetch=0,
            # Batch innermost: pe's block index is unchanged across consecutive
            # inner steps, so the pe tile is not re-fetched once per batch.
            grid=(n_sf, B),
            in_specs=[
                pl.BlockSpec((None, tS, Df), lambda s, b: (b, s, 0)),  # x tile, batch squeezed
                pl.BlockSpec((tS, Df), lambda s, b: (s, 0)),           # pe tile, batch-invariant
            ],
            out_specs=pl.BlockSpec((None, tS, Df), lambda s, b: (b, s, 0)),
        ),
        compiler_params=pltpu.CompilerParams(
            dimension_semantics=("parallel", "parallel"),
            vmem_limit_bytes=vmem_limit,
        ),
        cost_estimate=cost,
    )(xf, pef)
    return out.reshape(B, S, D)


if __name__ == "__main__":
    B, S, D = 2, 8, 32
    MAX_LEN = 256

    key = jax.random.PRNGKey(0)
    x = jax.random.normal(key, (B, S, D), dtype=jnp.float32)

    pe = _build_pe(D, MAX_LEN)

    out = positional_encoding(x, pe)
    out = jax.block_until_ready(out)

    # reference check in plain JAX
    ref = x + pe[None, :S, :]
    assert out.shape == (B, S, D)
    assert out.dtype == ref.dtype
    np.testing.assert_allclose(np.asarray(out), np.asarray(ref), rtol=1e-6, atol=1e-6)

    print("KERNEL_OK")
</pallas_src>

<mosaic_0001>
module attributes {stable_mosaic.version = 11 : i64} {
  func.func @_pos_enc_kernel(%arg0: i32, %arg1: memref<2x256xf32, #tpu.memory_space<vmem>>, %arg2: memref<2x256xf32, #tpu.memory_space<vmem>>, %arg3: memref<2x256xf32, #tpu.memory_space<vmem>>) attributes {dimension_semantics = [#tpu.dimension_semantics<parallel>], iteration_bounds = array<i64: 1>, scalar_prefetch = 0 : i64, scratch_operands = 0 : i64, tpu.core_type = #tpu.core_type<tc>, window_params = [{transform_indices = @transform_0, window_bounds = array<i64: 2, 256>}, {pipeline_mode = #tpu.pipeline_mode<synchronous>, transform_indices = @transform_1, window_bounds = array<i64: 2, 256>}, {transform_indices = @transform_2, window_bounds = array<i64: 2, 256>}]} {
    %c0 = arith.constant 0 : index
    %c0_0 = arith.constant 0 : index
    %0 = vector.load %arg1[%c0, %c0_0] : memref<2x256xf32, #tpu.memory_space<vmem>>, vector<2x256xf32>
    %c0_1 = arith.constant 0 : index
    %c0_2 = arith.constant 0 : index
    %1 = vector.load %arg2[%c0_1, %c0_2] : memref<2x256xf32, #tpu.memory_space<vmem>>, vector<2x256xf32>
    %2 = arith.addf %0, %1 : vector<2x256xf32>
    %c0_3 = arith.constant 0 : index
    %c0_4 = arith.constant 0 : index
    %3 = vector.load %arg3[%c0_3, %c0_4] : memref<2x256xf32, #tpu.memory_space<vmem>>, vector<2x256xf32>
    tpu.vector_store %arg3[%c0_3, %c0_4], %2 {strides = array<i32>} : memref<2x256xf32, #tpu.memory_space<vmem>>, vector<2x256xf32>,
    return
  }
  func.func @transform_0(%arg0: i32) -> (i32, i32) {
    %c0_i32 = arith.constant 0 : i32
    %c0_i32_0 = arith.constant 0 : i32
    return %arg0, %c0_i32 : i32, i32
  }
  func.func @transform_1(%arg0: i32) -> (i32, i32) {
    %c0_i32 = arith.constant 0 : i32
    %c0_i32_0 = arith.constant 0 : i32
    %c0_i32_1 = arith.constant 0 : i32
    return %c0_i32, %c0_i32_0 : i32, i32
  }
  func.func @transform_2(%arg0: i32) -> (i32, i32) {
    %c0_i32 = arith.constant 0 : i32
    %c0_i32_0 = arith.constant 0 : i32
    return %arg0, %c0_i32 : i32, i32
  }
}

</mosaic_0001>

<bundles_post_ra>
// kernel: tpu_custom_call.1
= control target key start
LH: loop header
LB: loop body
LE: loop exit
PB: predicated region body
PF: predicated region fallthrough
CT: control target
= control target key end

     0   :  { %7 = vsyncpa [#allocation3], 0  ;;  %s170_s0 = inlined_call_operand.hbm [shape: f32[2,256], index: 0, kind: input, shape index: {}]   ;;  %s171_s1 = inlined_call_operand.hbm [shape: f32[2,256], index: 1, kind: input, shape index: {}]   ;;  %s172_s2 = inlined_call_operand.hbm [shape: f32[2,256], index: 2, kind: output, shape index: {}]  }
   0x1   :  { %8 = vsyncpa [#allocation6], 0 }
   0x2   :  { %9 = vsyncpa [#allocation4], 0  ;;  %s15_s11 = sshll.u32 %s170_s0, 4  ;;  %s143_s12 = smov [#allocation2]   ;;  %s16_s11 = int_to_ptr.hbm [resolvable:$true] %s15_s11 }
   0x3   :  { %s17_s13 = sshll.u32 %s143_s12, 4  ;;  %s26_s16 = sshll.u32 %s171_s1, 4  ;;  %s18_s13 = int_to_ptr.vmem [resolvable:$true] %s17_s13  ;;  %s27_s16 = int_to_ptr.hbm [resolvable:$true] %s26_s16 }
   0x4   :  { %20 = dma.hbm_to_vmem [thread:$0]  %s16_s11, 64, %s18_s13, [#allocation3]  }
   0x5   :  { %s144_s17 = smov [#allocation5]  }
   0x6   :  { %s28_s18 = sshll.u32 %s144_s17, 4  ;;  %s29_s18 = int_to_ptr.vmem [resolvable:$true] %s28_s18 }
   0x7   :  { %31 = dma.hbm_to_vmem [thread:$0]  %s27_s16, 64, %s29_s18, [#allocation6]  }
   0x8   :  { %137 = dma.done.wait [#allocation3], 64  }
   0x9   :  { %138 = vsyncadd [#allocation3], 4294967232 }
   0xa   :  { %139 = dma.done.wait [#allocation6], 64  }
   0xb   :  { %140 = vsyncadd [#allocation6], 4294967232  ;;  %s145_s19 = smov [#allocation7]   ;;  %s51_s22 = sshll.u32 %s172_s2, 4  ;;  %v40_v0 = vld [vmem:[#allocation2] sm:$0xf]  ;;  %s52_s22 = int_to_ptr.hbm [resolvable:$true] %s51_s22 }
   0xc   :  { %s49_s0 = sshll.u32 %s145_s19, 4  ;;  %v41_v1 = vld [vmem:[#allocation5] sm:$0xf]  ;;  %s50_s0 = int_to_ptr.vmem [resolvable:$true] %s49_s0 }
   0xd   :  { %v42_v2 = vadd.f32 %v41_v1, %v40_v0 }
   0xf   :  { %43 = vst [vmem:[#allocation7] sm:$0xf] %v42_v2 }
  0x10   :  { %54 = dma.vmem_to_hbm [thread:$0]  %s50_s0, 64, %s52_s22, [#allocation4]  }
  0x11   :  { %141 = dma.done.wait [#allocation4], 64  }
  0x12   :  { %142 = vsyncadd [#allocation4], 4294967232 }
  0x13   :  { %59 = vsyncpa [#allocation3], 1 }
  0x14   :  { %60 = vsyncpa [#allocation6], 1 }
  0x15   :  { %61 = vsyncpa [#allocation4], 1 }

</bundles_post_ra>
